<compile_context>
chip_gen: v7x
topology: tpu7x:2x2x1
jax: 0.10.0
libtpu: 0.0.40
codegen_flags: <defaults>
</compile_context>

<pallas_src>
import functools

import jax
import jax.numpy as jnp
from jax.experimental import pallas as pl
from jax.experimental.pallas import tpu as pltpu

EPS = 1e-5


def _is_pow2(n):
    return n > 0 and (n & (n - 1)) == 0


def _segmented_sum(v, seg, n_cols, mask):
    """Sum within each contiguous `seg`-wide lane group of v (R, n_cols); result is
    broadcast back to every lane of its group.  `seg` must be a power of two.
    Uses only full-lane-width XLU rolls + VPU adds (no narrow masked reductions)."""
    # 1) circular sliding-window sums of length `seg`: s[i] = sum_j v[i+j], j<seg
    s = v
    shift = 1
    while shift < seg:
        s = s + pltpu.roll(s, n_cols - shift, 1)   # s[i] += s[(i + shift) % n_cols]
        shift *= 2
    # 2) keep only the lane at each group start (it holds the exact group sum) ...
    s = jnp.where(mask, s, 0.0)
    # 3) ... and propagate it forward over the group.  Never crosses a group
    #    boundary: only multiples of `seg` are non-zero and total shift = seg-1.
    shift = 1
    while shift < seg:
        s = s + pltpu.roll(s, shift, 1)            # s[i] += s[(i - shift) % n_cols]
        shift *= 2
    return s


def _expand_norm_kernel(x_ref, w_ref, p_ref, o_ref, *, c_out, n_cols, use_roll):
    # x_ref: (R, W*C_in)          w_ref: (W*C_in, n_cols)
    # p_ref: (3, n_cols)  packed (bias, gamma, beta), pre-tiled per group
    # o_ref: (R, n_cols)  columns ordered (kh, w, kw, co)
    y = jnp.dot(x_ref[...], w_ref[...], preferred_element_type=jnp.float32)
    y = y + p_ref[0:1, :]                      # conv bias
    gamma = p_ref[1:2, :]
    beta = p_ref[2:3, :]
    inv_c = 1.0 / c_out

    if use_roll:
        # Fused LayerNorm over each c_out-wide lane group via roll-based
        # segmented reductions (all ops full lane width, stats in f32).
        col = jax.lax.broadcasted_iota(jnp.int32, (1, n_cols), 1)
        mask = (col & (c_out - 1)) == 0        # group-start lanes
        mean = _segmented_sum(y, c_out, n_cols, mask) * inv_c
        d = y - mean
        var = _segmented_sum(d * d, c_out, n_cols, mask) * inv_c
        inv = jax.lax.rsqrt(var + EPS)
        o_ref[...] = d * (inv * gamma) + beta
    else:
        # Fallback for non-power-of-two LN width: per-group narrow reductions.
        o_ref[...] = y
        n_groups = n_cols // c_out
        for g in range(n_groups):
            lo = g * c_out
            hi = lo + c_out
            grp = o_ref[:, lo:hi]
            mu = jnp.mean(grp, axis=-1, keepdims=True)
            d = grp - mu
            var = jnp.mean(d * d, axis=-1, keepdims=True)
            inv = jax.lax.rsqrt(var + EPS)
            o_ref[:, lo:hi] = d * (inv * gamma[:, lo:hi]) + beta[:, lo:hi]


def _pick_block_rows(n_rows, target):
    """Row-tile over (B*H): prefer >=2 grid steps (v7x megacore) and a divisor of
    n_rows (no padded tail rows); math is row-local so a padded tail is still safe."""
    if n_rows <= 8:
        return n_rows
    cap = min(target, max(8, n_rows // 2))
    cap = max(8, (cap // 8) * 8)
    for r in range(cap, 7, -8):
        if n_rows % r == 0:
            return r
    return cap


@functools.partial(jax.jit, static_argnames=("block_rows",))
def final_patch_expansion(x, w_conv, bias, gamma, beta, *, block_rows=256):
    """x: (B, H, W, C_in) NHWC.  w_conv: PyTorch ConvTranspose2d weight
    (in_ch, out_ch, 2, 2).  bias/gamma/beta: (C_out,).  Returns (B, 2H, 2W, C_out)."""
    B, H, W, C_in = x.shape
    C_out = w_conv.shape[1]
    BH = B * H
    n_groups = 2 * W * 2                     # (kh, w, kw) output pixels per (b, h) row
    n_cols = n_groups * C_out

    # ---- fold the 4-tap scatter into the weight (trace-time, tiny tensors) ----
    # D_kh[ci, kw*C_out + co] = w_conv[ci, co, kh, kw]
    d0 = jnp.transpose(w_conv[:, :, 0, :], (0, 2, 1)).reshape(C_in, 2 * C_out)
    d1 = jnp.transpose(w_conv[:, :, 1, :], (0, 2, 1)).reshape(C_in, 2 * C_out)
    eye_w = jnp.eye(W, dtype=x.dtype)
    w_big = jnp.concatenate(
        [jnp.kron(eye_w, d0), jnp.kron(eye_w, d1)], axis=1)   # (W*C_in, n_cols)

    params = jnp.stack([jnp.tile(bias, n_groups),
                        jnp.tile(gamma, n_groups),
                        jnp.tile(beta, n_groups)])            # (3, n_cols)

    x2 = x.reshape(BH, W * C_in)             # free row-major reshape

    R = _pick_block_rows(BH, block_rows)
    grid = (pl.cdiv(BH, R),)

    kernel = functools.partial(_expand_norm_kernel, c_out=C_out, n_cols=n_cols,
                               use_roll=_is_pow2(C_out))
    out = pl.pallas_call(
        kernel,
        out_shape=jax.ShapeDtypeStruct((BH, n_cols), jnp.float32),
        grid_spec=pltpu.PrefetchScalarGridSpec(
            num_scalar_prefetch=0,
            grid=grid,
            in_specs=[
                pl.BlockSpec((R, W * C_in), lambda i: (i, 0)),
                pl.BlockSpec((W * C_in, n_cols), lambda i: (0, 0)),
                pl.BlockSpec((3, n_cols), lambda i: (0, 0)),
            ],
            out_specs=pl.BlockSpec((R, n_cols), lambda i: (i, 0)),
        ),
        compiler_params=pltpu.CompilerParams(
            dimension_semantics=("parallel",)),
    )(x2, w_big, params)

    # (BH, 2*W*2*C_out) row-major == (B, H, 2, W, 2, C_out) == (B, 2H, 2W, C_out):
    # a pure (free) reshape, no transpose.
    return out.reshape(B, 2 * H, 2 * W, C_out)


def _reference(x, w_conv, bias, gamma, beta):
    """Pure-JAX reference mirroring the PyTorch module semantics."""
    B, H, W, C_in = x.shape
    C_out = w_conv.shape[1]
    # out[b, 2h+kh, 2w+kw, co] = sum_ci x[b,h,w,ci] * w_conv[ci, co, kh, kw] + bias
    y = jnp.einsum("bhwi,ioyx->bhywxo", x, w_conv) + bias   # (B, H, 2, W, 2, C_out)
    mean = jnp.mean(y, axis=-1, keepdims=True)
    var = jnp.mean(jnp.square(y - mean), axis=-1, keepdims=True)
    y = (y - mean) / jnp.sqrt(var + EPS) * gamma + beta
    return y.reshape(B, 2 * H, 2 * W, C_out)


if __name__ == "__main__":
    # Module config: dim = 32 -> ConvTranspose2d(32, 16, k=2, s=2), LayerNorm(16)
    dim = 32
    c_out = dim // 2
    B, H, W = 2, 8, 8

    key = jax.random.PRNGKey(0)
    kx, kw_, kb, kg, kbt = jax.random.split(key, 5)

    x = jax.random.normal(kx, (B, H, W, dim), dtype=jnp.float32)
    # PyTorch ConvTranspose2d weight layout: (in_ch, out_ch, kH, kW)
    w_conv = jax.random.normal(kw_, (dim, c_out, 2, 2), dtype=jnp.float32) * 0.1
    bias = jax.random.normal(kb, (c_out,), dtype=jnp.float32) * 0.1
    gamma = 1.0 + 0.1 * jax.random.normal(kg, (c_out,), dtype=jnp.float32)
    beta = 0.1 * jax.random.normal(kbt, (c_out,), dtype=jnp.float32)

    out = final_patch_expansion(x, w_conv, bias, gamma, beta)
    out = jax.block_until_ready(out)

    ref = _reference(x, w_conv, bias, gamma, beta)
    assert out.shape == (B, 2 * H, 2 * W, c_out), out.shape
    assert jnp.allclose(out, ref, atol=5e-4, rtol=5e-4), \
        float(jnp.max(jnp.abs(out - ref)))

    print("KERNEL_OK")
</pallas_src>

<mosaic_0001>
module attributes {stable_mosaic.version = 11 : i64} {
  func.func @_expand_norm_kernel(%arg0: i32, %arg1: memref<8x256xf32, #tpu.memory_space<vmem>>, %arg2: memref<256x512xf32, #tpu.memory_space<vmem>>, %arg3: memref<3x512xf32, #tpu.memory_space<vmem>>, %arg4: memref<8x512xf32, #tpu.memory_space<vmem>>) attributes {dimension_semantics = [#tpu.dimension_semantics<parallel>], iteration_bounds = array<i64: 2>, scalar_prefetch = 0 : i64, scratch_operands = 0 : i64, tpu.core_type = #tpu.core_type<tc>, window_params = [{transform_indices = @transform_0, window_bounds = array<i64: 8, 256>}, {pipeline_mode = #tpu.pipeline_mode<synchronous>, transform_indices = @transform_1, window_bounds = array<i64: 256, 512>}, {pipeline_mode = #tpu.pipeline_mode<synchronous>, transform_indices = @transform_2, window_bounds = array<i64: 3, 512>}, {transform_indices = @transform_3, window_bounds = array<i64: 8, 512>}]} {
    %c0 = arith.constant 0 : index
    %c0_0 = arith.constant 0 : index
    %0 = vector.load %arg1[%c0, %c0_0] : memref<8x256xf32, #tpu.memory_space<vmem>>, vector<8x256xf32>
    %c0_1 = arith.constant 0 : index
    %c0_2 = arith.constant 0 : index
    %1 = vector.load %arg2[%c0_1, %c0_2] : memref<256x512xf32, #tpu.memory_space<vmem>>, vector<256x512xf32>
    %cst = arith.constant dense<0.000000e+00> : vector<8x512xf32>
    %2 = tpu.matmul %0, %1, %cst {dimension_numbers = #tpu.dot_dimension_numbers<[1], [0], [0], [1], [0, 0, 1, 1], [], []>} : vector<8x256xf32>, vector<256x512xf32>, vector<8x512xf32> -> vector<8x512xf32>
    %c0_3 = arith.constant 0 : index
    %c0_4 = arith.constant 0 : index
    %3 = vector.load %arg3[%c0_3, %c0_4] : memref<3x512xf32, #tpu.memory_space<vmem>>, vector<1x512xf32>
    %4 = vector.broadcast %3 : vector<1x512xf32> to vector<8x512xf32>
    %5 = arith.addf %2, %4 : vector<8x512xf32>
    %c1 = arith.constant 1 : index
    %c0_5 = arith.constant 0 : index
    %6 = vector.load %arg3[%c1, %c0_5] : memref<3x512xf32, #tpu.memory_space<vmem>>, vector<1x512xf32>
    %c2 = arith.constant 2 : index
    %c0_6 = arith.constant 0 : index
    %7 = vector.load %arg3[%c2, %c0_6] : memref<3x512xf32, #tpu.memory_space<vmem>>, vector<1x512xf32>
    %8 = tpu.iota {dimensions = array<i32: 1>} : vector<1x512xi32>
    %c15_i32 = arith.constant 15 : i32
    %9 = vector.broadcast %c15_i32 : i32 to vector<1x512xi32>
    %10 = arith.andi %8, %9 : vector<1x512xi32>
    %c0_i32 = arith.constant 0 : i32
    %11 = vector.broadcast %c0_i32 : i32 to vector<1x512xi32>
    %12 = arith.cmpi eq, %10, %11 : vector<1x512xi32>
    %c511_i32 = arith.constant 511 : i32
    %13 = tpu.dynamic_rotate %5 by %c511_i32 dim 1 : vector<8x512xf32>, i32 -> vector<8x512xf32>
    %14 = arith.addf %5, %13 : vector<8x512xf32>
    %c510_i32 = arith.constant 510 : i32
    %15 = tpu.dynamic_rotate %14 by %c510_i32 dim 1 : vector<8x512xf32>, i32 -> vector<8x512xf32>
    %16 = arith.addf %14, %15 : vector<8x512xf32>
    %c508_i32 = arith.constant 508 : i32
    %17 = tpu.dynamic_rotate %16 by %c508_i32 dim 1 : vector<8x512xf32>, i32 -> vector<8x512xf32>
    %18 = arith.addf %16, %17 : vector<8x512xf32>
    %c504_i32 = arith.constant 504 : i32
    %19 = tpu.dynamic_rotate %18 by %c504_i32 dim 1 : vector<8x512xf32>, i32 -> vector<8x512xf32>
    %20 = arith.addf %18, %19 : vector<8x512xf32>
    %cst_7 = arith.constant 0.000000e+00 : f32
    %21 = vector.shape_cast %12 : vector<1x512xi1> to vector<1x512xi1>
    %22 = vector.broadcast %21 : vector<1x512xi1> to vector<8x512xi1>
    %23 = vector.broadcast %cst_7 : f32 to vector<8x512xf32>
    %24 = arith.select %22, %20, %23 : vector<8x512xi1>, vector<8x512xf32>
    %c1_i32 = arith.constant 1 : i32
    %25 = tpu.dynamic_rotate %24 by %c1_i32 dim 1 : vector<8x512xf32>, i32 -> vector<8x512xf32>
    %26 = arith.addf %24, %25 : vector<8x512xf32>
    %c2_i32 = arith.constant 2 : i32
    %27 = tpu.dynamic_rotate %26 by %c2_i32 dim 1 : vector<8x512xf32>, i32 -> vector<8x512xf32>
    %28 = arith.addf %26, %27 : vector<8x512xf32>
    %c4_i32 = arith.constant 4 : i32
    %29 = tpu.dynamic_rotate %28 by %c4_i32 dim 1 : vector<8x512xf32>, i32 -> vector<8x512xf32>
    %30 = arith.addf %28, %29 : vector<8x512xf32>
    %c8_i32 = arith.constant 8 : i32
    %31 = tpu.dynamic_rotate %30 by %c8_i32 dim 1 : vector<8x512xf32>, i32 -> vector<8x512xf32>
    %32 = arith.addf %30, %31 : vector<8x512xf32>
    %cst_8 = arith.constant 6.250000e-02 : f32
    %33 = vector.broadcast %cst_8 : f32 to vector<8x512xf32>
    %34 = arith.mulf %32, %33 : vector<8x512xf32>
    %35 = arith.subf %5, %34 : vector<8x512xf32>
    %36 = arith.mulf %35, %35 : vector<8x512xf32>
    %c511_i32_9 = arith.constant 511 : i32
    %37 = tpu.dynamic_rotate %36 by %c511_i32_9 dim 1 : vector<8x512xf32>, i32 -> vector<8x512xf32>
    %38 = arith.addf %36, %37 : vector<8x512xf32>
    %c510_i32_10 = arith.constant 510 : i32
    %39 = tpu.dynamic_rotate %38 by %c510_i32_10 dim 1 : vector<8x512xf32>, i32 -> vector<8x512xf32>
    %40 = arith.addf %38, %39 : vector<8x512xf32>
    %c508_i32_11 = arith.constant 508 : i32
    %41 = tpu.dynamic_rotate %40 by %c508_i32_11 dim 1 : vector<8x512xf32>, i32 -> vector<8x512xf32>
    %42 = arith.addf %40, %41 : vector<8x512xf32>
    %c504_i32_12 = arith.constant 504 : i32
    %43 = tpu.dynamic_rotate %42 by %c504_i32_12 dim 1 : vector<8x512xf32>, i32 -> vector<8x512xf32>
    %44 = arith.addf %42, %43 : vector<8x512xf32>
    %cst_13 = arith.constant 0.000000e+00 : f32
    %45 = vector.shape_cast %12 : vector<1x512xi1> to vector<1x512xi1>
    %46 = vector.broadcast %45 : vector<1x512xi1> to vector<8x512xi1>
    %47 = vector.broadcast %cst_13 : f32 to vector<8x512xf32>
    %48 = arith.select %46, %44, %47 : vector<8x512xi1>, vector<8x512xf32>
    %c1_i32_14 = arith.constant 1 : i32
    %49 = tpu.dynamic_rotate %48 by %c1_i32_14 dim 1 : vector<8x512xf32>, i32 -> vector<8x512xf32>
    %50 = arith.addf %48, %49 : vector<8x512xf32>
    %c2_i32_15 = arith.constant 2 : i32
    %51 = tpu.dynamic_rotate %50 by %c2_i32_15 dim 1 : vector<8x512xf32>, i32 -> vector<8x512xf32>
    %52 = arith.addf %50, %51 : vector<8x512xf32>
    %c4_i32_16 = arith.constant 4 : i32
    %53 = tpu.dynamic_rotate %52 by %c4_i32_16 dim 1 : vector<8x512xf32>, i32 -> vector<8x512xf32>
    %54 = arith.addf %52, %53 : vector<8x512xf32>
    %c8_i32_17 = arith.constant 8 : i32
    %55 = tpu.dynamic_rotate %54 by %c8_i32_17 dim 1 : vector<8x512xf32>, i32 -> vector<8x512xf32>
    %56 = arith.addf %54, %55 : vector<8x512xf32>
    %cst_18 = arith.constant 6.250000e-02 : f32
    %57 = vector.broadcast %cst_18 : f32 to vector<8x512xf32>
    %58 = arith.mulf %56, %57 : vector<8x512xf32>
    %cst_19 = arith.constant 9.99999974E-6 : f32
    %59 = vector.broadcast %cst_19 : f32 to vector<8x512xf32>
    %60 = arith.addf %58, %59 : vector<8x512xf32>
    %61 = math.rsqrt %60 : vector<8x512xf32>
    %62 = vector.broadcast %6 : vector<1x512xf32> to vector<8x512xf32>
    %63 = arith.mulf %61, %62 : vector<8x512xf32>
    %64 = arith.mulf %35, %63 : vector<8x512xf32>
    %65 = vector.broadcast %7 : vector<1x512xf32> to vector<8x512xf32>
    %66 = arith.addf %64, %65 : vector<8x512xf32>
    %c0_20 = arith.constant 0 : index
    %c0_21 = arith.constant 0 : index
    %67 = vector.load %arg4[%c0_20, %c0_21] : memref<8x512xf32, #tpu.memory_space<vmem>>, vector<8x512xf32>
    tpu.vector_store %arg4[%c0_20, %c0_21], %66 {strides = array<i32>} : memref<8x512xf32, #tpu.memory_space<vmem>>, vector<8x512xf32>,
    return
  }
  func.func @transform_0(%arg0: i32) -> (i32, i32) {
    %c0_i32 = arith.constant 0 : i32
    %c0_i32_0 = arith.constant 0 : i32
    return %arg0, %c0_i32 : i32, i32
  }
  func.func @transform_1(%arg0: i32) -> (i32, i32) {
    %c0_i32 = arith.constant 0 : i32
    %c0_i32_0 = arith.constant 0 : i32
    %c0_i32_1 = arith.constant 0 : i32
    return %c0_i32, %c0_i32_0 : i32, i32
  }
  func.func @transform_2(%arg0: i32) -> (i32, i32) {
    %c0_i32 = arith.constant 0 : i32
    %c0_i32_0 = arith.constant 0 : i32
    %c0_i32_1 = arith.constant 0 : i32
    return %c0_i32, %c0_i32_0 : i32, i32
  }
  func.func @transform_3(%arg0: i32) -> (i32, i32) {
    %c0_i32 = arith.constant 0 : i32
    %c0_i32_0 = arith.constant 0 : i32
    return %arg0, %c0_i32 : i32, i32
  }
}

</mosaic_0001>

<bundles_post_ra>
// kernel: tile.18
= control target key start
LH: loop header
LB: loop body
LE: loop exit
PB: predicated region body
PF: predicated region fallthrough
CT: control target
= control target key end

     0   :  { %s40_s0 = inlined_call_operand.vmem [shape: f32[16], index: 0, kind: input, shape index: {}]   ;;  %s41_s1 = inlined_call_operand.vmem [shape: f32[32,16], index: 1, kind: output, shape index: {}]  }
   0x1   :  { %v4_v0 = vld [vmem:[%s40_s0] ss:$0 sm:$0xff] }
   0x2   :  { %5 = vst [vmem:[%s41_s1] sm:$0xff] %v4_v0  ;;  %12 = vst [vmem:[%s41_s1 + $0x8] sm:$0xff] %v4_v0 }
   0x3   :  { %13 = vst [vmem:[%s41_s1 + $0x10] sm:$0xff] %v4_v0  ;;  %14 = vst [vmem:[%s41_s1 + $0x18] sm:$0xff] %v4_v0 }

// kernel: tile.27
= control target key start
LH: loop header
LB: loop body
LE: loop exit
PB: predicated region body
PF: predicated region fallthrough
CT: control target
= control target key end

     0   :  { %s89_s8 = smov 112   ;;  %s90_s11 = smov 80   ;;  %vm3_vm0 = vcmask 130048   ;;  %vm9_vm1 = vcmask 1048448   ;;  %vm15_vm2 = vcmask 917248   ;;  %vm21_vm3 = vcmask 786048   ;;  %s142_s0 = inlined_call_operand.vmem [shape: f32[32,16], index: 0, kind: input, shape index: {}]   ;;  %s143_s1 = inlined_call_operand.vmem [shape: f32[1,512], index: 1, kind: output, shape index: {}]  }
   0x1   :  { %v72_v0 = vld [vmem:[%s142_s0 + $0x7] ss:$8 sm:$0xf]   ;;  %v74_v1 = vld [vmem:[%s142_s0 + $0x5] ss:$8 sm:$0xf]  }
   0x2   :  { %7 = vrot.lane.b32.xlu0 %v72_v0, %s89_s8  ;;  %19 = vrot.lane.b32.xlu1 %v74_v1, %s90_s11  ;;  %v73_v2 = vld [vmem:[%s142_s0 + $0x6] ss:$8 sm:$0xf]   ;;  %v75_v3 = vld [vmem:[%s142_s0 + $0x4] ss:$8 sm:$0xf]  }
   0x3   :  { %s91_s16 = smov 96   ;;  %v2_v4 = vld [vmem:[%s142_s0] ss:$8 sm:$0xf]   ;;  %s92_s19 = smov 64   ;;  %vm27_vm4 = vcmask 654848  }
   0x4   :  { %v76_v5 = vld [vmem:[%s142_s0 + $0x3] ss:$8 sm:$0xf]   ;;  %4 = vst.msk [vmem:[#allocation0] ss:$8 sm:$0xf] %vm3_vm0, %v2_v4  }
   0x5   :  { %v77_v6 = vld [vmem:[%s142_s0 + $0x2] ss:$8 sm:$0xf]   ;;  %s93_s24 = smov 48   ;;  %s94_s25 = smov 32   ;;  %vm33_vm5 = vcmask 523648  }
   0x6   :  { %13 = vrot.lane.b32.xlu0 %v73_v2, %s91_s16  ;;  %25 = vrot.lane.b32.xlu1 %v75_v3, %s92_s19  ;;  %v78_v7 = vld [vmem:[%s142_s0 + $0x1] ss:$8 sm:$0xf]   ;;  %s95_s0 = smov 16   ;;  %vm39_vm6 = vcmask 392448   ;;  %vm45_vm7 = vcmask 261248  }
   0xa   :  { %31 = vrot.lane.b32.xlu0 %v76_v5, %s93_s24  ;;  %37 = vrot.lane.b32.xlu1 %v77_v6, %s94_s25 }
   0xe   :  { %43 = vrot.lane.b32.xlu0 %v78_v7, %s95_s0 }
  0x74   :  { %v8_v8 = vpop.permute.xlu0 %7   ;;  %v20_v9 = vpop.permute.xlu1 %19  }
  0x75   :  { %10 = vst.msk [vmem:[#allocation0] ss:$8 sm:$0xf] %vm9_vm1, %v8_v8  }
  0x78   :  { %v14_v10 = vpop.permute.xlu0 %13   ;;  %v26_v11 = vpop.permute.xlu1 %25  }
  0x79   :  { %16 = vst.msk [vmem:[#allocation0] ss:$8 sm:$0xf] %vm15_vm2, %v14_v10  }
  0x7a   :  { %22 = vst.msk [vmem:[#allocation0] ss:$8 sm:$0xf] %vm21_vm3, %v20_v9  }
  0x7b   :  { %28 = vst.msk [vmem:[#allocation0] ss:$8 sm:$0xf] %vm27_vm4, %v26_v11  }
  0x7c   :  { %v32_v12 = vpop.permute.xlu0 %31   ;;  %v38_v13 = vpop.permute.xlu1 %37  }
  0x7d   :  { %34 = vst.msk [vmem:[#allocation0] ss:$8 sm:$0xf] %vm33_vm5, %v32_v12  }
  0x7e   :  { %40 = vst.msk [vmem:[#allocation0] ss:$8 sm:$0xf] %vm39_vm6, %v38_v13  }
  0x80   :  { %v44_v14 = vpop.permute.xlu0 %43  }
  0x81   :  { %46 = vst.msk [vmem:[#allocation0] ss:$8 sm:$0xf] %vm45_vm7, %v44_v14  }
  0x88   :  { %v50_v15 = vld [vmem:[#allocation0] sm:$0x1]  ;;  %v54_v16 = vld [vmem:[#allocation0 + $0x8] sm:$0x1]  ;;  %v59_v17 = vld [vmem:[#allocation0 + $0x10] sm:$0x1] }
  0x89   :  { %52 = vst [vmem:[%s143_s1] sm:$0x1] %v50_v15  ;;  %79 = vst [vmem:[%s143_s1 + $0x1] sm:$0x1] %v54_v16  ;;  %v65_v18 = vld [vmem:[#allocation0 + $0x18] sm:$0x1] }
  0x8a   :  { %80 = vst [vmem:[%s143_s1 + $0x2] sm:$0x1] %v59_v17  ;;  %81 = vst [vmem:[%s143_s1 + $0x3] sm:$0x1] %v65_v18 }

// kernel: final_patch_expansion.1
= control target key start
LH: loop header
LB: loop body
LE: loop exit
PB: predicated region body
PF: predicated region fallthrough
CT: control target
= control target key end

     0   :  { %s1102_s12 = smov 0   ;;  %s1828_s0 = inlined_call_operand.vmem [shape: f32[16,256], index: 0, kind: input, shape index: {}]   ;;  %s1829_s1 = inlined_call_operand.vmem [shape: f32[256,512], index: 1, kind: input, shape index: {}]   ;;  %s1830_s2 = inlined_call_operand.vmem [shape: f32[3,512], index: 2, kind: input, shape index: {}]   ;;  %s1831_s3 = inlined_call_operand.vmem [shape: f32[16,512], index: 3, kind: output, shape index: {}]  }
   0x1 LB: > { %s899_s13 = sadd.s32 4294967295, %s1072_s12   ;;  %p903_p0 = scmp.ge.s32.totalorder %s1072_s12, 1  ;;  %s1072_s12 = sphi %s1102_s12, %s13_s12  }
   0x2   : > { %p137_p1 = scmp.lt.s32.totalorder %s1072_s12, 3 }
   0x4   : > { %p138_p2 = pnand %p903_p0, %p137_p1 }
   0x5   : > { %v174_v0 = vld [vmem:[%s1829_s1 + $0x8] sm:$0xff] (!%p138_p2)  ;;  %v176_v2 = vld [vmem:[%s1829_s1 + $0x18] sm:$0xff] (!%p138_p2)  ;;  %v173_v5 = vld [vmem:[%s1829_s1] sm:$0xff] (!%p138_p2)  ;;  %p1316_p3 = scmp.lt.s32.totalorder (!%p138_p2), %s899_s13, 1  ;;  %s1075_s30 = smov (!%p138_p2), 126  }
   0x6   : > { %141 = sbr.rel (%p138_p2) target bundleno = 2246 (0x8c6), region = 32  ;;  %v178_v1 = vld [vmem:[%s1829_s1 + $0x28] sm:$0xff] (!%p138_p2)  ;;  %v180_v4 = vld [vmem:[%s1829_s1 + $0x38] sm:$0xff] (!%p138_p2)  ;;  %v177_v6 = vld [vmem:[%s1829_s1 + $0x20] sm:$0xff] (!%p138_p2)  ;;  %s1076_s4 = smov (!%p138_p2), 124  }
   0x7   : > { %v914_v3 = vpack.c.bf16 (!%p138_p2), %v178_v1, %v174_v0  ;;  %v978_v7 = vpack.c.bf16 (!%p138_p2), %v180_v4, %v176_v2  ;;  %v916_v8 = vpack.c.bf16 (!%p138_p2), %v177_v6, %v173_v5  ;;  %v175_v9 = vld [vmem:[%s1829_s1 + $0x10] sm:$0xff] (!%p138_p2)  ;;  %v182_v11 = vld [vmem:[%s1829_s1 + $0x48] sm:$0xff] (!%p138_p2)  ;;  %v184_v14 = vld [vmem:[%s1829_s1 + $0x58] sm:$0xff] (!%p138_p2)  ;;  %s1077_s5 = smov (!%p138_p2), 120   ;;  %s1078_s7 = smov (!%p138_p2), 1  }
   0x8   : > { %v179_v10 = vld [vmem:[%s1829_s1 + $0x30] sm:$0xff] (!%p138_p2)  ;;  %v186_v13 = vld [vmem:[%s1829_s1 + $0x68] sm:$0xff] (!%p138_p2)  ;;  %v188_v15 = vld [vmem:[%s1829_s1 + $0x78] sm:$0xff] (!%p138_p2)  ;;  %s1080_s8 = smov (!%p138_p2), 4   ;;  %s1081_s9 = smov (!%p138_p2), 8  }
   0x9   : > { %915 = vmatprep.subr.bf16.mxu0 (!%p138_p2), %v914_v3  ;;  %v980_v12 = vpack.c.bf16 (!%p138_p2), %v179_v10, %v175_v9  ;;  %979 = vmatprep.subr.bf16.mxu1 (!%p138_p2), %v978_v7  ;;  %v918_v16 = vpack.c.bf16 (!%p138_p2), %v186_v13, %v182_v11  ;;  %v982_v17 = vpack.c.bf16 (!%p138_p2), %v188_v15, %v184_v14  ;;  %v181_v18 = vld [vmem:[%s1829_s1 + $0x40] sm:$0xff] (!%p138_p2)  ;;  %v183_v20 = vld [vmem:[%s1829_s1 + $0x50] sm:$0xff] (!%p138_p2)  ;;  %v190_v23 = vld [vmem:[%s1829_s1 + $0x88] sm:$0xff] (!%p138_p2) }
   0xa   : > { %917 = vmatpush1.bf16.msra.mxu0 (!%p138_p2), %v916_v8  ;;  %v185_v19 = vld [vmem:[%s1829_s1 + $0x60] sm:$0xff] (!%p138_p2)  ;;  %v187_v22 = vld [vmem:[%s1829_s1 + $0x70] sm:$0xff] (!%p138_p2)  ;;  %v194_v24 = vld [vmem:[%s1829_s1 + $0xa8] sm:$0xff] (!%p138_p2) }
   0xb   : > { %981 = vmatpush1.bf16.msra.mxu1 (!%p138_p2), %v980_v12  ;;  %v920_v21 = vpack.c.bf16 (!%p138_p2), %v185_v19, %v181_v18  ;;  %919 = vmatprep.subr.bf16.mxu0 (!%p138_p2), %v918_v16  ;;  %v984_v25 = vpack.c.bf16 (!%p138_p2), %v187_v22, %v183_v20  ;;  %v922_v26 = vpack.c.bf16 (!%p138_p2), %v194_v24, %v190_v23  ;;  %v192_v27 = vld [vmem:[%s1829_s1 + $0x98] sm:$0xff] (!%p138_p2)  ;;  %v189_v29 = vld [vmem:[%s1829_s1 + $0x80] sm:$0xff] (!%p138_p2)  ;;  %v191_v32 = vld [vmem:[%s1829_s1 + $0x90] sm:$0xff] (!%p138_p2) }
   0xc   : > { %983 = vmatprep.subr.bf16.mxu1 (!%p138_p2), %v982_v17  ;;  %v196_v28 = vld [vmem:[%s1829_s1 + $0xb8] sm:$0xff] (!%p138_p2)  ;;  %v193_v31 = vld [vmem:[%s1829_s1 + $0xa0] sm:$0xff] (!%p138_p2)  ;;  %v195_v33 = vld [vmem:[%s1829_s1 + $0xb0] sm:$0xff] (!%p138_p2) }
   0xd   : > { %v986_v30 = vpack.c.bf16 %v196_v28, %v192_v27  ;;  %v924_v34 = vpack.c.bf16 %v193_v31, %v189_v29  ;;  %v198_v35 = vld [vmem:[%s1829_s1 + $0xc8] sm:$0xff]  ;;  %v200_v37 = vld [vmem:[%s1829_s1 + $0xd8] sm:$0xff]  ;;  %v988_v38 = vpack.c.bf16 %v195_v33, %v191_v32  ;;  %v197_v41 = vld [vmem:[%s1829_s1 + $0xc0] sm:$0xff]  ;;  %s1842_s13 = smov (!%p1316_p3, %s899_s13), 1 }
   0xe   : > { %921 = vmatpush1.bf16.msra.mxu0 %v920_v21  ;;  %v202_v36 = vld [vmem:[%s1829_s1 + $0xe8] sm:$0xff]  ;;  %v204_v40 = vld [vmem:[%s1829_s1 + $0xf8] sm:$0xff]  ;;  %v201_v42 = vld [vmem:[%s1829_s1 + $0xe0] sm:$0xff]  ;;  %s912_s6 = sshll.u32 %s1842_s13, 4  ;;  %s913_s16 = sshll.u32 %s1842_s13, 5 }
   0xf   : > { %985 = vmatpush1.bf16.msra.mxu1 %v984_v25  ;;  %923 = vmatprep.subr.bf16.mxu0 %v922_v26  ;;  %v926_v39 = vpack.c.bf16 %v202_v36, %v198_v35  ;;  %v990_v43 = vpack.c.bf16 %v204_v40, %v200_v37  ;;  %v199_v44 = vld [vmem:[%s1829_s1 + $0xd0] sm:$0xff]  ;;  %v206_v46 = vld [vmem:[%s1829_s1 + $0x108] sm:$0xff]  ;;  %v208_v48 = vld [vmem:[%s1829_s1 + $0x118] sm:$0xff]  ;;  %v928_v50 = vpack.c.bf16 %v201_v42, %v197_v41  ;;  %s1402_s27 = scalar_lea.vmem %s1828_s0, %s912_s6  ;;  %s1079_s6 = smov 2  }
  0x10   : > { %987 = vmatprep.subr.bf16.mxu1 %v986_v30  ;;  %v203_v45 = vld [vmem:[%s1829_s1 + $0xf0] sm:$0xff]  ;;  %v210_v47 = vld [vmem:[%s1829_s1 + $0x128] sm:$0xff]  ;;  %v212_v49 = vld [vmem:[%s1829_s1 + $0x138] sm:$0xff]  ;;  %s170_s19 = scalar_lea.vmem %s1831_s3, %s913_s16 }
  0x11   : > { %v992_v51 = vpack.c.bf16 %v203_v45, %v199_v44  ;;  %v930_v52 = vpack.c.bf16 %v210_v47, %v206_v46  ;;  %v205_v53 = vld [vmem:[%s1829_s1 + $0x100] sm:$0xff]  ;;  %v207_v55 = vld [vmem:[%s1829_s1 + $0x110] sm:$0xff]  ;;  %v994_v56 = vpack.c.bf16 %v212_v49, %v208_v48  ;;  %v214_v58 = vld [vmem:[%s1829_s1 + $0x148] sm:$0xff] }
  0x12   : > { %925 = vmatpush1.bf16.msra.mxu0 %v924_v34  ;;  %v209_v54 = vld [vmem:[%s1829_s1 + $0x120] sm:$0xff]  ;;  %v211_v57 = vld [vmem:[%s1829_s1 + $0x130] sm:$0xff]  ;;  %v218_v59 = vld [vmem:[%s1829_s1 + $0x168] sm:$0xff] }
  0x13   : > { %989 = vmatpush1.bf16.msra.mxu1 %v988_v38  ;;  %927 = vmatprep.subr.bf16.mxu0 %v926_v39  ;;  %v216_v60 = vld [vmem:[%s1829_s1 + $0x158] sm:$0xff]  ;;  %v932_v62 = vpack.c.bf16 %v209_v54, %v205_v53  ;;  %v996_v63 = vpack.c.bf16 %v211_v57, %v207_v55  ;;  %v934_v0 = vpack.c.bf16 %v218_v59, %v214_v58  ;;  %v213_v1 = vld [vmem:[%s1829_s1 + $0x140] sm:$0xff]  ;;  %v215_v3 = vld [vmem:[%s1829_s1 + $0x150] sm:$0xff] }
  0x14   : > { %991 = vmatprep.subr.bf16.mxu1 %v990_v43  ;;  %v220_v61 = vld [vmem:[%s1829_s1 + $0x178] sm:$0xff]  ;;  %v217_v2 = vld [vmem:[%s1829_s1 + $0x160] sm:$0xff]  ;;  %v219_v5 = vld [vmem:[%s1829_s1 + $0x170] sm:$0xff] }
  0x15   : > { %v998_v4 = vpack.c.bf16 %v220_v61, %v216_v60  ;;  %v222_v6 = vld [vmem:[%s1829_s1 + $0x188] sm:$0xff]  ;;  %v224_v8 = vld [vmem:[%s1829_s1 + $0x198] sm:$0xff]  ;;  %v936_v10 = vpack.c.bf16 %v217_v2, %v213_v1  ;;  %v1000_v11 = vpack.c.bf16 %v219_v5, %v215_v3  ;;  %v221_v13 = vld [vmem:[%s1829_s1 + $0x180] sm:$0xff] }
  0x16   : > { %929 = vmatpush1.bf16.msra.mxu0 %v928_v50  ;;  %v226_v7 = vld [vmem:[%s1829_s1 + $0x1a8] sm:$0xff]  ;;  %v228_v9 = vld [vmem:[%s1829_s1 + $0x1b8] sm:$0xff]  ;;  %v225_v14 = vld [vmem:[%s1829_s1 + $0x1a0] sm:$0xff] }
  0x17   : > { %993 = vmatpush1.bf16.msra.mxu1 %v992_v51  ;;  %931 = vmatprep.subr.bf16.mxu0 %v930_v52  ;;  %v938_v12 = vpack.c.bf16 %v226_v7, %v222_v6  ;;  %v223_v15 = vld [vmem:[%s1829_s1 + $0x190] sm:$0xff]  ;;  %v1002_v16 = vpack.c.bf16 %v228_v9, %v224_v8  ;;  %v230_v18 = vld [vmem:[%s1829_s1 + $0x1c8] sm:$0xff]  ;;  %v232_v20 = vld [vmem:[%s1829_s1 + $0x1d8] sm:$0xff]  ;;  %v940_v22 = vpack.c.bf16 %v225_v14, %v221_v13 }
  0x18   : > { %995 = vmatprep.subr.bf16.mxu1 %v994_v56  ;;  %v227_v17 = vld [vmem:[%s1829_s1 + $0x1b0] sm:$0xff]  ;;  %v234_v19 = vld [vmem:[%s1829_s1 + $0x1e8] sm:$0xff]  ;;  %v236_v21 = vld [vmem:[%s1829_s1 + $0x1f8] sm:$0xff] }
  0x19   : > { %v1004_v23 = vpack.c.bf16 %v227_v17, %v223_v15  ;;  %v942_v24 = vpack.c.bf16 %v234_v19, %v230_v18  ;;  %v229_v25 = vld [vmem:[%s1829_s1 + $0x1c0] sm:$0xff]  ;;  %v231_v27 = vld [vmem:[%s1829_s1 + $0x1d0] sm:$0xff]  ;;  %v1006_v28 = vpack.c.bf16 %v236_v21, %v232_v20  ;;  %v238_v30 = vld [vmem:[%s1829_s1 + $0x208] sm:$0xff] }
  0x1a   : > { %933 = vmatpush1.bf16.msra.mxu0 %v932_v62  ;;  %v233_v26 = vld [vmem:[%s1829_s1 + $0x1e0] sm:$0xff]  ;;  %v235_v29 = vld [vmem:[%s1829_s1 + $0x1f0] sm:$0xff]  ;;  %v242_v31 = vld [vmem:[%s1829_s1 + $0x228] sm:$0xff] }
  0x1b   : > { %997 = vmatpush1.bf16.msra.mxu1 %v996_v63  ;;  %935 = vmatprep.subr.bf16.mxu0 %v934_v0  ;;  %v240_v32 = vld [vmem:[%s1829_s1 + $0x218] sm:$0xff]  ;;  %v944_v34 = vpack.c.bf16 %v233_v26, %v229_v25  ;;  %v1008_v35 = vpack.c.bf16 %v235_v29, %v231_v27  ;;  %v946_v36 = vpack.c.bf16 %v242_v31, %v238_v30  ;;  %v237_v37 = vld [vmem:[%s1829_s1 + $0x200] sm:$0xff]  ;;  %v239_v39 = vld [vmem:[%s1829_s1 + $0x210] sm:$0xff] }
  0x1c   : > { %999 = vmatprep.subr.bf16.mxu1 %v998_v4  ;;  %v244_v33 = vld [vmem:[%s1829_s1 + $0x238] sm:$0xff]  ;;  %v241_v38 = vld [vmem:[%s1829_s1 + $0x220] sm:$0xff]  ;;  %v243_v41 = vld [vmem:[%s1829_s1 + $0x230] sm:$0xff] }
  0x1d   : > { %v1010_v40 = vpack.c.bf16 %v244_v33, %v240_v32  ;;  %v246_v42 = vld [vmem:[%s1829_s1 + $0x248] sm:$0xff]  ;;  %v248_v44 = vld [vmem:[%s1829_s1 + $0x258] sm:$0xff]  ;;  %v948_v46 = vpack.c.bf16 %v241_v38, %v237_v37  ;;  %v1012_v47 = vpack.c.bf16 %v243_v41, %v239_v39  ;;  %v245_v49 = vld [vmem:[%s1829_s1 + $0x240] sm:$0xff] }
  0x1e   : > { %937 = vmatpush1.bf16.msra.mxu0 %v936_v10  ;;  %v250_v43 = vld [vmem:[%s1829_s1 + $0x268] sm:$0xff]  ;;  %v252_v45 = vld [vmem:[%s1829_s1 + $0x278] sm:$0xff]  ;;  %v249_v50 = vld [vmem:[%s1829_s1 + $0x260] sm:$0xff] }
  0x1f   : > { %1001 = vmatpush1.bf16.msra.mxu1 %v1000_v11  ;;  %939 = vmatprep.subr.bf16.mxu0 %v938_v12  ;;  %v950_v48 = vpack.c.bf16 %v250_v43, %v246_v42  ;;  %v247_v51 = vld [vmem:[%s1829_s1 + $0x250] sm:$0xff]  ;;  %v1014_v52 = vpack.c.bf16 %v252_v45, %v248_v44  ;;  %v254_v54 = vld [vmem:[%s1829_s1 + $0x288] sm:$0xff]  ;;  %v256_v56 = vld [vmem:[%s1829_s1 + $0x298] sm:$0xff]  ;;  %v952_v58 = vpack.c.bf16 %v249_v50, %v245_v49 }
  0x20   : > { %1003 = vmatprep.subr.bf16.mxu1 %v1002_v16  ;;  %v251_v53 = vld [vmem:[%s1829_s1 + $0x270] sm:$0xff]  ;;  %v258_v55 = vld [vmem:[%s1829_s1 + $0x2a8] sm:$0xff]  ;;  %v260_v57 = vld [vmem:[%s1829_s1 + $0x2b8] sm:$0xff] }
  0x21   : > { %v1016_v59 = vpack.c.bf16 %v251_v53, %v247_v51  ;;  %v954_v60 = vpack.c.bf16 %v258_v55, %v254_v54  ;;  %v253_v61 = vld [vmem:[%s1829_s1 + $0x280] sm:$0xff]  ;;  %v255_v63 = vld [vmem:[%s1829_s1 + $0x290] sm:$0xff]  ;;  %v1018_v0 = vpack.c.bf16 %v260_v57, %v256_v56  ;;  %v262_v2 = vld [vmem:[%s1829_s1 + $0x2c8] sm:$0xff] }
  0x22   : > { %941 = vmatpush1.bf16.msra.mxu0 %v940_v22  ;;  %v257_v62 = vld [vmem:[%s1829_s1 + $0x2a0] sm:$0xff]  ;;  %v259_v1 = vld [vmem:[%s1829_s1 + $0x2b0] sm:$0xff]  ;;  %v266_v3 = vld [vmem:[%s1829_s1 + $0x2e8] sm:$0xff] }
  0x23   : > { %1005 = vmatpush1.bf16.msra.mxu1 %v1004_v23  ;;  %943 = vmatprep.subr.bf16.mxu0 %v942_v24  ;;  %v264_v4 = vld [vmem:[%s1829_s1 + $0x2d8] sm:$0xff]  ;;  %v956_v6 = vpack.c.bf16 %v257_v62, %v253_v61  ;;  %v261_v7 = vld [vmem:[%s1829_s1 + $0x2c0] sm:$0xff]  ;;  %v1020_v8 = vpack.c.bf16 %v259_v1, %v255_v63  ;;  %v958_v9 = vpack.c.bf16 %v266_v3, %v262_v2  ;;  %v263_v11 = vld [vmem:[%s1829_s1 + $0x2d0] sm:$0xff]  ;;  %v303_v2 = vlaneseq }
  0x24   : > { %1007 = vmatprep.subr.bf16.mxu1 %v1006_v28  ;;  %v268_v5 = vld [vmem:[%s1829_s1 + $0x2f8] sm:$0xff]  ;;  %v265_v10 = vld [vmem:[%s1829_s1 + $0x2e0] sm:$0xff]  ;;  %v267_v12 = vld [vmem:[%s1829_s1 + $0x2f0] sm:$0xff] }
  0x25   : > { %v1022_v13 = vpack.c.bf16 %v268_v5, %v264_v4  ;;  %v270_v14 = vld [vmem:[%s1829_s1 + $0x308] sm:$0xff]  ;;  %v272_v17 = vld [vmem:[%s1829_s1 + $0x318] sm:$0xff]  ;;  %v960_v19 = vpack.c.bf16 %v265_v10, %v261_v7  ;;  %v1024_v20 = vpack.c.bf16 %v267_v12, %v263_v11  ;;  %v269_v22 = vld [vmem:[%s1829_s1 + $0x300] sm:$0xff]  ;;  %v304_v3 = vshrl.u32 %v303_v2, 7 }
  0x26   : > { %945 = vmatpush1.bf16.msra.mxu0 %v944_v34  ;;  %v274_v15 = vld [vmem:[%s1829_s1 + $0x328] sm:$0xff]  ;;  %v276_v18 = vld [vmem:[%s1829_s1 + $0x338] sm:$0xff]  ;;  %v273_v23 = vld [vmem:[%s1829_s1 + $0x320] sm:$0xff] }
  0x27   : > { %1009 = vmatpush1.bf16.msra.mxu1 %v1008_v35  ;;  %947 = vmatprep.subr.bf16.mxu0 %v946_v36  ;;  %v172_v16 = vld [vmem:[%s1402_s27 + $0x8] sm:$0xff]  ;;  %v962_v21 = vpack.c.bf16 %v274_v15, %v270_v14  ;;  %v271_v24 = vld [vmem:[%s1829_s1 + $0x310] sm:$0xff]  ;;  %v1026_v25 = vpack.c.bf16 %v276_v18, %v272_v17  ;;  %v280_v29 = vld [vmem:[%s1829_s1 + $0x358] sm:$0xff]  ;;  %v964_v31 = vpack.c.bf16 %v273_v23, %v269_v22  ;;  %v1514_v4 = vsub.s32 0, %v304_v3 }
  0x28   : > { %1011 = vmatprep.subr.bf16.mxu1 %v1010_v40  ;;  %387 = vmatprep.mubr.f32.mxu0 %v172_v16  ;;  %v275_v26 = vld [vmem:[%s1829_s1 + $0x330] sm:$0xff]  ;;  %v278_v27 = vld [vmem:[%s1829_s1 + $0x348] sm:$0xff]  ;;  %v284_v30 = vld [vmem:[%s1829_s1 + $0x378] sm:$0xff]  ;;  %v1521_v7 = vsub.s32 3, %v304_v3 }
  0x29   : > { %458 = vmatprep.mubr.f32.mxu1 %v172_v16  ;;  %v282_v28 = vld [vmem:[%s1829_s1 + $0x368] sm:$0xff]  ;;  %v1028_v32 = vpack.c.bf16 %v275_v26, %v271_v24  ;;  %v277_v34 = vld [vmem:[%s1829_s1 + $0x340] sm:$0xff]  ;;  %v279_v36 = vld [vmem:[%s1829_s1 + $0x350] sm:$0xff]  ;;  %v1030_v37 = vpack.c.bf16 %v284_v30, %v280_v29 }
  0x2a   : > { %949 = vmatpush1.bf16.msra.mxu0 %v948_v46  ;;  %v966_v33 = vpack.c.bf16 %v282_v28, %v278_v27  ;;  %v281_v35 = vld [vmem:[%s1829_s1 + $0x360] sm:$0xff]  ;;  %v283_v38 = vld [vmem:[%s1829_s1 + $0x370] sm:$0xff]  ;;  %v286_v39 = vld [vmem:[%s1829_s1 + $0x388] sm:$0xff] }
  0x2b   : > { %1013 = vmatpush1.bf16.msra.mxu1 %v1012_v47  ;;  %951 = vmatprep.subr.bf16.mxu0 %v950_v48  ;;  %v290_v40 = vld [vmem:[%s1829_s1 + $0x3a8] sm:$0xff]  ;;  %v288_v41 = vld [vmem:[%s1829_s1 + $0x398] sm:$0xff]  ;;  %v968_v43 = vpack.c.bf16 %v281_v35, %v277_v34  ;;  %v1032_v44 = vpack.c.bf16 %v283_v38, %v279_v36  ;;  %v285_v46 = vld [vmem:[%s1829_s1 + $0x380] sm:$0xff] }
  0x2c   : > { %1015 = vmatprep.subr.bf16.mxu1 %v1014_v52  ;;  %v292_v42 = vld [vmem:[%s1829_s1 + $0x3b8] sm:$0xff]  ;;  %v970_v45 = vpack.c.bf16 %v290_v40, %v286_v39  ;;  %v289_v47 = vld [vmem:[%s1829_s1 + $0x3a0] sm:$0xff]  ;;  %v287_v48 = vld [vmem:[%s1829_s1 + $0x390] sm:$0xff] }
  0x2d   : > { %v1034_v49 = vpack.c.bf16 %v292_v42, %v288_v41  ;;  %v291_v50 = vld [vmem:[%s1829_s1 + $0x3b0] sm:$0xff]  ;;  %v294_v51 = vld [vmem:[%s1829_s1 + $0x3c8] sm:$0xff]  ;;  %v296_v53 = vld [vmem:[%s1829_s1 + $0x3d8] sm:$0xff]  ;;  %v972_v55 = vpack.c.bf16 %v289_v47, %v285_v46 }
  0x2e   : > { %953 = vmatpush1.bf16.msra.mxu0 %v952_v58  ;;  %v298_v52 = vld [vmem:[%s1829_s1 + $0x3e8] sm:$0xff]  ;;  %v300_v54 = vld [vmem:[%s1829_s1 + $0x3f8] sm:$0xff]  ;;  %v1036_v56 = vpack.c.bf16 %v291_v50, %v287_v48  ;;  %v293_v58 = vld [vmem:[%s1829_s1 + $0x3c0] sm:$0xff] }
  0x2f   : > { %1017 = vmatpush1.bf16.msra.mxu1 %v1016_v59  ;;  %955 = vmatprep.subr.bf16.mxu0 %v954_v60  ;;  %v974_v57 = vpack.c.bf16 %v298_v52, %v294_v51  ;;  %v297_v59 = vld [vmem:[%s1829_s1 + $0x3e0] sm:$0xff]  ;;  %v1038_v60 = vpack.c.bf16 %v300_v54, %v296_v53  ;;  %v295_v61 = vld [vmem:[%s1829_s1 + $0x3d0] sm:$0xff] }
  0x30   : > { %1019 = vmatprep.subr.bf16.mxu1 %v1018_v0  ;;  %v299_v62 = vld [vmem:[%s1829_s1 + $0x3f0] sm:$0xff]  ;;  %v976_v63 = vpack.c.bf16 %v297_v59, %v293_v58  ;;  %v171_v1 = vld [vmem:[%s1402_s27] sm:$0xff]  ;;  %s1074_s27 = smov 127  }
  0x31   : > { %v1040_v0 = vpack.c.bf16 %v299_v62, %v295_v61  ;;  %v301_v5 = vld [vmem:[%s1830_s2] ss:$4 sm:$0xf] }
  0x32   : > { %957 = vmatpush1.bf16.msra.mxu0 %v956_v6  ;;  %v1519_v6 = vsub.s32 2, %v304_v3  ;;  %v318_v12 = vrot.slane %v301_v5, %v1521_v7 }
  0x33   : > { %1021 = vmatpush1.bf16.msra.mxu1 %v1020_v8  ;;  %959 = vmatprep.subr.bf16.mxu0 %v958_v9  ;;  %v306_v8 = vrot.slane %v301_v5, %v1514_v4  ;;  %v1524_v9 = vsub.s32 1, %v304_v3 }
  0x34   : > { %1023 = vmatprep.subr.bf16.mxu1 %v1022_v13  ;;  %v314_v10 = vrot.slane %v301_v5, %v1519_v6 }
  0x35   : > { %v310_v15 = vrot.slane %v301_v5, %v1524_v9 }
  0x36   : > { %961 = vmatpush1.bf16.msra.mxu0 %v960_v19 }
  0x37   : > { %1025 = vmatpush1.bf16.msra.mxu1 %v1024_v20  ;;  %963 = vmatprep.subr.bf16.mxu0 %v962_v21  ;;  %v1545_v21 = vand.u32 127, %v303_v2 }
  0x38   : > { %1027 = vmatprep.subr.bf16.mxu1 %v1026_v25 }
  0x39   : > { %vm490_vm0 = vcmp.lt.s32.totalorder %v1545_v21, 127  ;;  %vm507_vm1 = vcmp.lt.s32.totalorder %v1545_v21, 126  ;;  %vm524_vm2 = vcmp.lt.s32.totalorder %v1545_v21, 124  ;;  %v471_v58 = vadd.s32 128, %v1545_v21 }
  0x3a   : > { %965 = vmatpush1.bf16.msra.mxu0 %v964_v31  ;;  %v474_v59 = vand.u32 15, %v1545_v21  ;;  %vm541_vm3 = vcmp.lt.s32.totalorder %v1545_v21, 120  ;;  %vm570_vm8 = vcmp.lt.s32.totalorder %v1545_v21, 1  ;;  %vm587_vm9 = vcmp.lt.s32.totalorder %v1545_v21, 2 }
  0x3b   : > { %1029 = vmatpush1.bf16.msra.mxu1 %v1028_v32  ;;  %967 = vmatprep.subr.bf16.mxu0 %v966_v33  ;;  %vm604_vm10 = vcmp.lt.s32.totalorder %v1545_v21, 4  ;;  %vm621_vm11 = vcmp.lt.s32.totalorder %v1545_v21, 8 }
  0x3c   : > { %1031 = vmatprep.subr.bf16.mxu1 %v1030_v37  ;;  %vm1597_vm4 = vcmp.eq.s32.totalorder %v474_v59, 0 }
  0x3e   : > { %969 = vmatpush1.bf16.msra.mxu0 %v968_v43 }
  0x3f   : > { %1033 = vmatpush1.bf16.msra.mxu1 %v1032_v44  ;;  %971 = vmatprep.subr.bf16.mxu0 %v970_v45 }
  0x40   : > { %1035 = vmatprep.subr.bf16.mxu1 %v1034_v49 }
  0x42   : > { %973 = vmatpush1.bf16.msra.mxu0 %v972_v55 }
  0x43   : > { %1037 = vmatpush1.bf16.msra.mxu1 %v1036_v56  ;;  %975 = vmatprep.subr.bf16.mxu0 %v974_v57 }
  0x44   : > { %1039 = vmatprep.subr.bf16.mxu1 %v1038_v60  ;;  %v472_v60 = vadd.s32 256, %v1545_v21 }
  0x46   : > { %977 = vmatpush1.bf16.msra.mxu0 %v976_v63  ;;  %v475_v63 = vand.u32 15, %v471_v58  ;;  %v476_v3 = vand.u32 15, %v472_v60 }
  0x47   : > { %1041 = vmatpush1.bf16.msra.mxu1 %v1040_v0  ;;  %v473_v0 = vadd.s32 384, %v1545_v21 }
  0x48   : > { %vm1603_vm5 = vcmp.eq.s32.totalorder %v475_v63, 0  ;;  %vm1614_vm6 = vcmp.eq.s32.totalorder %v476_v3, 0 }
  0x49   : > { %388 = vmatmul.mubr.f32.vlgmr.msra.gmra.mrb[0].mxu0 %v171_v1 }
  0x4a   : > { %459 = vmatmul.mubr.f32.vlgmr.msra.gmra.mrb[0].mxu1 %v171_v1 }
 0x11c   : > { %v389_v11 = vpop.f32.mrb[0].mxu0 }
 0x11d   : > { %v1528_v13 = vadd.f32 %v389_v11, %v306_v8  ;;  %v460_v14 = vpop.f32.mrb[0].mxu1  ;;  %v391_v16 = vpop.f32.mrb[1].mxu0 }
 0x11e   : > { %v1531_v17 = vadd.f32 %v460_v14, %v314_v10  ;;  %v462_v18 = vpop.f32.mrb[1].mxu1  ;;  %v1539_v20 = vadd.f32 %v391_v16, %v310_v15  ;;  %v477_v14 = vand.u32 15, %v473_v0 }
 0x11f   : > { %482 = vrot.lane.b32.xlu0 %v1528_v13, %s1074_s27  ;;  %v1537_v19 = vadd.f32 %v462_v18, %v318_v12 }
 0x120   : > { %486 = vrot.lane.b32.xlu1 %v1531_v17, %s1074_s27  ;;  %vm1624_vm7 = vcmp.eq.s32.totalorder %v477_v14, 0 }
 0x123   : > { %484 = vrot.lane.b32.xlu0 %v1539_v20, %s1074_s27 }
 0x124   : > { %488 = vrot.lane.b32.xlu1 %v1537_v19, %s1074_s27 }
 0x191   : > { %v483_v22 = vpop.permute.xlu0 %482 }
 0x192   : > { %v487_v23 = vpop.permute.xlu1 %486 }
 0x195   : > { %v485_v24 = vpop.permute.xlu0 %484 }
 0x196   : > { %v489_v25 = vpop.permute.xlu1 %488  ;;  %v492_v26 = vsel %vm490_vm0, %v485_v24, %v487_v23  ;;  %v493_v27 = vsel %vm490_vm0, %v483_v22, %v485_v24 }
 0x197   : > { %v495_v28 = vadd.f32 %v493_v27, %v1528_v13  ;;  %v496_v29 = vadd.f32 %v492_v26, %v1539_v20  ;;  %v491_v30 = vsel %vm490_vm0, %v487_v23, %v489_v25  ;;  %v494_v31 = vsel %vm490_vm0, %v489_v25, %v483_v22 }
 0x198   : > { %v497_v32 = vadd.f32 %v491_v30, %v1531_v17  ;;  %v498_v33 = vadd.f32 %v494_v31, %v1537_v19 }
 0x199   : > { %499 = vrot.lane.b32.xlu0 %v495_v28, %s1075_s30  ;;  %501 = vrot.lane.b32.xlu1 %v496_v29, %s1075_s30 }
 0x19d   : > { %503 = vrot.lane.b32.xlu0 %v497_v32, %s1075_s30  ;;  %505 = vrot.lane.b32.xlu1 %v498_v33, %s1075_s30 }
 0x20b   : > { %v500_v34 = vpop.permute.xlu0 %499  ;;  %v502_v35 = vpop.permute.xlu1 %501 }
 0x20c   : > { %v510_v36 = vsel %vm507_vm1, %v500_v34, %v502_v35 }
 0x20d   : > { %v512_v37 = vadd.f32 %v510_v36, %v495_v28 }
 0x20f   : > { %v504_v38 = vpop.permute.xlu0 %503  ;;  %516 = vrot.lane.b32.xlu0 %v512_v37, %s1076_s4  ;;  %v506_v39 = vpop.permute.xlu1 %505 }
 0x210   : > { %v509_v40 = vsel %vm507_vm1, %v502_v35, %v504_v38  ;;  %v508_v41 = vsel %vm507_vm1, %v504_v38, %v506_v39  ;;  %v511_v44 = vsel %vm507_vm1, %v506_v39, %v500_v34 }
 0x211   : > { %v513_v42 = vadd.f32 %v509_v40, %v496_v29  ;;  %v514_v43 = vadd.f32 %v508_v41, %v497_v32  ;;  %v515_v45 = vadd.f32 %v511_v44, %v498_v33 }
 0x213   : > { %518 = vrot.lane.b32.xlu1 %v513_v42, %s1076_s4  ;;  %520 = vrot.lane.b32.xlu0 %v514_v43, %s1076_s4 }
 0x217   : > { %522 = vrot.lane.b32.xlu1 %v515_v45, %s1076_s4 }
 0x281   : > { %v517_v46 = vpop.permute.xlu0 %516 }
 0x285   : > { %v521_v47 = vpop.permute.xlu0 %520  ;;  %v519_v48 = vpop.permute.xlu1 %518 }
 0x286   : > { %v526_v49 = vsel %vm524_vm2, %v519_v48, %v521_v47  ;;  %v527_v50 = vsel %vm524_vm2, %v517_v46, %v519_v48 }
 0x287   : > { %v529_v51 = vadd.f32 %v527_v50, %v512_v37  ;;  %v530_v52 = vadd.f32 %v526_v49, %v513_v42 }
 0x289   : > { %533 = vrot.lane.b32.xlu0 %v529_v51, %s1077_s5  ;;  %535 = vrot.lane.b32.xlu1 %v530_v52, %s1077_s5  ;;  %v523_v53 = vpop.permute.xlu1 %522 }
 0x28a   : > { %v525_v54 = vsel %vm524_vm2, %v521_v47, %v523_v53  ;;  %v528_v55 = vsel %vm524_vm2, %v523_v53, %v517_v46 }
 0x28b   : > { %v531_v56 = vadd.f32 %v525_v54, %v514_v43  ;;  %v532_v57 = vadd.f32 %v528_v55, %v515_v45 }
 0x28d   : > { %539 = vrot.lane.b32.xlu1 %v532_v57, %s1077_s5  ;;  %537 = vrot.lane.b32.xlu0 %v531_v56, %s1077_s5 }
 0x2fb   : > { %v534_v61 = vpop.permute.xlu0 %533  ;;  %v536_v62 = vpop.permute.xlu1 %535 }
 0x2fc   : > { %v544_v1 = vsel %vm541_vm3, %v534_v61, %v536_v62 }
 0x2fd   : > { %v546_v5 = vadd.f32 %v544_v1, %v529_v51 }
 0x2ff   : > { %v538_v8 = vpop.permute.xlu0 %537  ;;  %v540_v10 = vpop.permute.xlu1 %539  ;;  %v558_v11 = vsel %vm1597_vm4, %v546_v5, 0.0 }
 0x300   : > { %v543_v15 = vsel %vm541_vm3, %v536_v62, %v538_v8  ;;  %v542_v16 = vsel %vm541_vm3, %v538_v8, %v540_v10  ;;  %v545_v18 = vsel %vm541_vm3, %v540_v10, %v534_v61  ;;  %562 = vrot.lane.b32.xlu0 %v558_v11, %s1078_s7 }
 0x301   : > { %v547_v23 = vadd.f32 %v543_v15, %v530_v52  ;;  %v548_v24 = vadd.f32 %v542_v16, %v531_v56  ;;  %v549_v25 = vadd.f32 %v545_v18, %v532_v57 }
 0x303   : > { %v559_v26 = vsel %vm1603_vm5, %v547_v23, 0.0  ;;  %v560_v27 = vsel %vm1614_vm6, %v548_v24, 0.0  ;;  %v561_v29 = vsel %vm1624_vm7, %v549_v25, 0.0 }
 0x304   : > { %564 = vrot.lane.b32.xlu1 %v559_v26, %s1078_s7  ;;  %566 = vrot.lane.b32.xlu0 %v560_v27, %s1078_s7 }
 0x308   : > { %568 = vrot.lane.b32.xlu1 %v561_v29, %s1078_s7 }
 0x372   : > { %v563_v30 = vpop.permute.xlu0 %562 }
 0x376   : > { %v565_v31 = vpop.permute.xlu1 %564  ;;  %v567_v34 = vpop.permute.xlu0 %566 }
 0x377   : > { %v573_v32 = vsel %vm570_vm8, %v563_v30, %v565_v31  ;;  %v572_v40 = vsel %vm570_vm8, %v565_v31, %v567_v34 }
 0x378   : > { %v576_v33 = vadd.f32 %v573_v32, %v559_v26  ;;  %v577_v41 = vadd.f32 %v572_v40, %v560_v27 }
 0x37a   : > { %581 = vrot.lane.b32.xlu1 %v576_v33, %s1079_s6  ;;  %v569_v35 = vpop.permute.xlu1 %568 }
 0x37b   : > { %v571_v36 = vsel %vm570_vm8, %v567_v34, %v569_v35  ;;  %v574_v37 = vsel %vm570_vm8, %v569_v35, %v563_v30 }
 0x37c   : > { %v575_v38 = vadd.f32 %v574_v37, %v558_v11  ;;  %v578_v39 = vadd.f32 %v571_v36, %v561_v29 }
 0x37e   : > { %579 = vrot.lane.b32.xlu0 %v575_v38, %s1079_s6  ;;  %585 = vrot.lane.b32.xlu1 %v578_v39, %s1079_s6 }
 0x382   : > { %583 = vrot.lane.b32.xlu0 %v577_v41, %s1079_s6 }
 0x3ec   : > { %v582_v42 = vpop.permute.xlu1 %581 }
 0x3f0   : > { %v580_v43 = vpop.permute.xlu0 %579  ;;  %v586_v44 = vpop.permute.xlu1 %585 }
 0x3f1   : > { %v590_v45 = vsel %vm587_vm9, %v580_v43, %v582_v42  ;;  %v591_v46 = vsel %vm587_vm9, %v586_v44, %v580_v43 }
 0x3f2   : > { %v593_v47 = vadd.f32 %v590_v45, %v576_v33  ;;  %v592_v48 = vadd.f32 %v591_v46, %v575_v38 }
 0x3f4   : > { %v584_v49 = vpop.permute.xlu0 %583  ;;  %598 = vrot.lane.b32.xlu1 %v593_v47, %s1080_s8  ;;  %596 = vrot.lane.b32.xlu0 %v592_v48, %s1080_s8 }
 0x3f5   : > { %v588_v50 = vsel %vm587_vm9, %v584_v49, %v586_v44  ;;  %v589_v51 = vsel %vm587_vm9, %v582_v42, %v584_v49 }
 0x3f6   : > { %v594_v52 = vadd.f32 %v589_v51, %v577_v41  ;;  %v595_v53 = vadd.f32 %v588_v50, %v578_v39 }
 0x3f8   : > { %600 = vrot.lane.b32.xlu0 %v594_v52, %s1080_s8  ;;  %602 = vrot.lane.b32.xlu1 %v595_v53, %s1080_s8 }
 0x466   : > { %v597_v54 = vpop.permute.xlu0 %596  ;;  %v599_v55 = vpop.permute.xlu1 %598 }
 0x467   : > { %v607_v56 = vsel %vm604_vm10, %v597_v54, %v599_v55 }
 0x468   : > { %v610_v57 = vadd.f32 %v607_v56, %v593_v47 }
 0x46a   : > { %v601_v58 = vpop.permute.xlu0 %600  ;;  %615 = vrot.lane.b32.xlu1 %v610_v57, %s1081_s9  ;;  %v603_v59 = vpop.permute.xlu1 %602 }
 0x46b   : > { %v605_v60 = vsel %vm604_vm10, %v601_v58, %v603_v59  ;;  %v608_v61 = vsel %vm604_vm10, %v603_v59, %v597_v54  ;;  %v606_v0 = vsel %vm604_vm10, %v599_v55, %v601_v58 }
 0x46c   : > { %v609_v62 = vadd.f32 %v608_v61, %v592_v48  ;;  %v612_v63 = vadd.f32 %v605_v60, %v595_v53  ;;  %v611_v1 = vadd.f32 %v606_v0, %v594_v52 }
 0x46e   : > { %613 = vrot.lane.b32.xlu0 %v609_v62, %s1081_s9  ;;  %619 = vrot.lane.b32.xlu1 %v612_v63, %s1081_s9 }
 0x472   : > { %617 = vrot.lane.b32.xlu0 %v611_v1, %s1081_s9 }
 0x4dc   : > { %v616_v3 = vpop.permute.xlu1 %615 }
 0x4e0   : > { %v614_v5 = vpop.permute.xlu0 %613  ;;  %v620_v8 = vpop.permute.xlu1 %619 }
 0x4e1   : > { %v624_v10 = vsel %vm621_vm11, %v614_v5, %v616_v3  ;;  %v625_v11 = vsel %vm621_vm11, %v620_v8, %v614_v5 }
 0x4e2   : > { %v627_v14 = vadd.f32 %v624_v10, %v610_v57  ;;  %v626_v15 = vadd.f32 %v625_v11, %v609_v62 }
 0x4e4   : > { %v631_v16 = vmul.f32 0.0625, %v627_v14  ;;  %v630_v18 = vmul.f32 0.0625, %v626_v15  ;;  %v618_v23 = vpop.permute.xlu0 %617 }
 0x4e5   : > { %v622_v24 = vsel %vm621_vm11, %v618_v23, %v620_v8  ;;  %v623_v25 = vsel %vm621_vm11, %v616_v3, %v618_v23 }
 0x4e6   : > { %v1680_v26 = vsub.f32 %v1539_v20, %v631_v16  ;;  %v1683_v27 = vsub.f32 %v1528_v13, %v630_v18  ;;  %v628_v29 = vadd.f32 %v623_v25, %v611_v1  ;;  %v629_v30 = vadd.f32 %v622_v24, %v612_v63 }
 0x4e8   : > { %v632_v31 = vmul.f32 0.0625, %v628_v29  ;;  %v633_v32 = vmul.f32 0.0625, %v629_v30  ;;  %v639_v33 = vmul.f32 %v1680_v26, %v1680_v26  ;;  %v638_v34 = vmul.f32 %v1683_v27, %v1683_v27 }
 0x4ea   : > { %v1690_v35 = vsub.f32 %v1531_v17, %v632_v31  ;;  %v1693_v36 = vsub.f32 %v1537_v19, %v633_v32  ;;  %644 = vrot.lane.b32.xlu1 %v639_v33, %s1074_s27  ;;  %642 = vrot.lane.b32.xlu0 %v638_v34, %s1074_s27 }
 0x4ec   : > { %v640_v13 = vmul.f32 %v1690_v35, %v1690_v35  ;;  %v641_v20 = vmul.f32 %v1693_v36, %v1693_v36 }
 0x4ee   : > { %646 = vrot.lane.b32.xlu0 %v640_v13, %s1074_s27  ;;  %648 = vrot.lane.b32.xlu1 %v641_v20, %s1074_s27 }
 0x55c   : > { %v643_v37 = vpop.permute.xlu0 %642  ;;  %v645_v17 = vpop.permute.xlu1 %644 }
 0x55d   : > { %v652_v19 = vsel %vm490_vm0, %v643_v37, %v645_v17 }
 0x55e   : > { %v654_v38 = vadd.f32 %v652_v19, %v638_v34 }
 0x560   : > { %v647_v39 = vpop.permute.xlu0 %646  ;;  %658 = vrot.lane.b32.xlu0 %v654_v38, %s1075_s30  ;;  %v649_v40 = vpop.permute.xlu1 %648 }
 0x561   : > { %v651_v41 = vsel %vm490_vm0, %v645_v17, %v647_v39  ;;  %v650_v42 = vsel %vm490_vm0, %v647_v39, %v649_v40  ;;  %v653_v45 = vsel %vm490_vm0, %v649_v40, %v643_v37 }
 0x562   : > { %v655_v43 = vadd.f32 %v651_v41, %v639_v33  ;;  %v656_v44 = vadd.f32 %v650_v42, %v640_v13  ;;  %v657_v46 = vadd.f32 %v653_v45, %v641_v20 }
 0x564   : > { %660 = vrot.lane.b32.xlu1 %v655_v43, %s1075_s30  ;;  %662 = vrot.lane.b32.xlu0 %v656_v44, %s1075_s30 }
 0x568   : > { %664 = vrot.lane.b32.xlu1 %v657_v46, %s1075_s30 }
 0x5d2   : > { %v659_v47 = vpop.permute.xlu0 %658 }
 0x5d6   : > { %v663_v48 = vpop.permute.xlu0 %662  ;;  %v661_v49 = vpop.permute.xlu1 %660 }
 0x5d7   : > { %v667_v50 = vsel %vm507_vm1, %v661_v49, %v663_v48  ;;  %v668_v51 = vsel %vm507_vm1, %v659_v47, %v661_v49 }
 0x5d8   : > { %v670_v52 = vadd.f32 %v668_v51, %v654_v38  ;;  %v671_v53 = vadd.f32 %v667_v50, %v655_v43 }
 0x5da   : > { %674 = vrot.lane.b32.xlu0 %v670_v52, %s1076_s4  ;;  %676 = vrot.lane.b32.xlu1 %v671_v53, %s1076_s4  ;;  %v665_v54 = vpop.permute.xlu1 %664 }
 0x5db   : > { %v666_v55 = vsel %vm507_vm1, %v663_v48, %v665_v54  ;;  %v669_v56 = vsel %vm507_vm1, %v665_v54, %v659_v47 }
 0x5dc   : > { %v672_v57 = vadd.f32 %v666_v55, %v656_v44  ;;  %v673_v58 = vadd.f32 %v669_v56, %v657_v46 }
 0x5de   : > { %680 = vrot.lane.b32.xlu1 %v673_v58, %s1076_s4  ;;  %678 = vrot.lane.b32.xlu0 %v672_v57, %s1076_s4 }
 0x64c   : > { %v675_v59 = vpop.permute.xlu0 %674  ;;  %v677_v60 = vpop.permute.xlu1 %676 }
 0x64d   : > { %v684_v61 = vsel %vm524_vm2, %v675_v59, %v677_v60 }
 0x64e   : > { %v686_v62 = vadd.f32 %v684_v61, %v670_v52 }
 0x650   : > { %v679_v63 = vpop.permute.xlu0 %678  ;;  %690 = vrot.lane.b32.xlu0 %v686_v62, %s1077_s5  ;;  %v681_v0 = vpop.permute.xlu1 %680 }
 0x651   : > { %v683_v1 = vsel %vm524_vm2, %v677_v60, %v679_v63  ;;  %v682_v3 = vsel %vm524_vm2, %v679_v63, %v681_v0  ;;  %v685_v10 = vsel %vm524_vm2, %v681_v0, %v675_v59 }
 0x652   : > { %v687_v5 = vadd.f32 %v683_v1, %v671_v53  ;;  %v688_v8 = vadd.f32 %v682_v3, %v672_v57  ;;  %v689_v11 = vadd.f32 %v685_v10, %v673_v58 }
 0x654   : > { %692 = vrot.lane.b32.xlu1 %v687_v5, %s1077_s5  ;;  %694 = vrot.lane.b32.xlu0 %v688_v8, %s1077_s5 }
 0x658   : > { %696 = vrot.lane.b32.xlu1 %v689_v11, %s1077_s5 }
 0x6c2   : > { %v691_v14 = vpop.permute.xlu0 %690 }
 0x6c6   : > { %v695_v15 = vpop.permute.xlu0 %694  ;;  %v693_v16 = vpop.permute.xlu1 %692 }
 0x6c7   : > { %v699_v18 = vsel %vm541_vm3, %v693_v16, %v695_v15  ;;  %v700_v23 = vsel %vm541_vm3, %v691_v14, %v693_v16 }
 0x6c8   : > { %v702_v24 = vadd.f32 %v700_v23, %v686_v62  ;;  %v703_v25 = vadd.f32 %v699_v18, %v687_v5 }
 0x6ca   : > { %v697_v29 = vpop.permute.xlu1 %696  ;;  %v706_v30 = vsel %vm1597_vm4, %v702_v24, 0.0  ;;  %v707_v31 = vsel %vm1603_vm5, %v703_v25, 0.0 }
 0x6cb   : > { %v698_v32 = vsel %vm541_vm3, %v695_v15, %v697_v29  ;;  %v701_v33 = vsel %vm541_vm3, %v697_v29, %v691_v14  ;;  %710 = vrot.lane.b32.xlu0 %v706_v30, %s1078_s7  ;;  %712 = vrot.lane.b32.xlu1 %v707_v31, %s1078_s7 }
 0x6cc   : > { %v704_v34 = vadd.f32 %v698_v32, %v688_v8  ;;  %v705_v13 = vadd.f32 %v701_v33, %v689_v11 }
 0x6ce   : > { %v709_v20 = vsel %vm1624_vm7, %v705_v13, 0.0  ;;  %v708_v2 = vsel %vm1614_vm6, %v704_v34, 0.0 }
 0x6cf   : > { %716 = vrot.lane.b32.xlu1 %v709_v20, %s1078_s7  ;;  %714 = vrot.lane.b32.xlu0 %v708_v2, %s1078_s7 }
 0x73d   : > { %v711_v12 = vpop.permute.xlu0 %710  ;;  %v713_v37 = vpop.permute.xlu1 %712 }
 0x73e   : > { %v720_v17 = vsel %vm570_vm8, %v711_v12, %v713_v37 }
 0x73f   : > { %v723_v19 = vadd.f32 %v720_v17, %v707_v31  ;;  %v909_v17 = vld [vmem:[%s1830_s2 + $0x2] ss:$4 sm:$0xf] }
 0x741   : > { %v715_v38 = vpop.permute.xlu0 %714  ;;  %728 = vrot.lane.b32.xlu1 %v723_v19, %s1079_s6  ;;  %v717_v39 = vpop.permute.xlu1 %716 }
 0x742   : > { %v718_v28 = vsel %vm570_vm8, %v715_v38, %v717_v39  ;;  %v721_v22 = vsel %vm570_vm8, %v717_v39, %v711_v12  ;;  %v719_v42 = vsel %vm570_vm8, %v713_v37, %v715_v38  ;;  %v908_v37 = vld [vmem:[%s1830_s2 + $0x1] ss:$4 sm:$0xf] }
 0x743   : > { %v722_v40 = vadd.f32 %v721_v22, %v706_v30  ;;  %v725_v41 = vadd.f32 %v718_v28, %v709_v20  ;;  %v724_v43 = vadd.f32 %v719_v42, %v708_v2  ;;  %v794_v21 = vrot.slane %v908_v37, %v1524_v9 }
 0x744   : > { %v798_v28 = vrot.slane %v908_v37, %v1519_v6  ;;  %v823_v22 = vrot.slane %v909_v17, %v1524_v9  ;;  %v802_v42 = vrot.slane %v908_v37, %v1521_v7 }
 0x745   : > { %726 = vrot.lane.b32.xlu0 %v722_v40, %s1079_s6  ;;  %732 = vrot.lane.b32.xlu1 %v725_v41, %s1079_s6 }
 0x749   : > { %730 = vrot.lane.b32.xlu0 %v724_v43, %s1079_s6 }
 0x7b3   : > { %v729_v44 = vpop.permute.xlu1 %728 }
 0x7b7   : > { %v727_v45 = vpop.permute.xlu0 %726  ;;  %v733_v46 = vpop.permute.xlu1 %732 }
 0x7b8   : > { %v736_v47 = vsel %vm587_vm9, %v727_v45, %v729_v44  ;;  %v737_v48 = vsel %vm587_vm9, %v733_v46, %v727_v45 }
 0x7b9   : > { %v739_v49 = vadd.f32 %v736_v47, %v723_v19  ;;  %v738_v50 = vadd.f32 %v737_v48, %v722_v40  ;;  %v790_v19 = vrot.slane %v908_v37, %v1514_v4  ;;  %v827_v48 = vrot.slane %v909_v17, %v1519_v6 }
 0x7bb   : > { %v731_v51 = vpop.permute.xlu0 %730  ;;  %744 = vrot.lane.b32.xlu1 %v739_v49, %s1080_s8  ;;  %742 = vrot.lane.b32.xlu0 %v738_v50, %s1080_s8 }
 0x7bc   : > { %v734_v52 = vsel %vm587_vm9, %v731_v51, %v733_v46  ;;  %v735_v53 = vsel %vm587_vm9, %v729_v44, %v731_v51 }
 0x7bd   : > { %v740_v54 = vadd.f32 %v735_v53, %v724_v43  ;;  %v741_v55 = vadd.f32 %v734_v52, %v725_v41  ;;  %v819_v41 = vrot.slane %v909_v17, %v1514_v4 }
 0x7bf   : > { %746 = vrot.lane.b32.xlu0 %v740_v54, %s1080_s8  ;;  %748 = vrot.lane.b32.xlu1 %v741_v55, %s1080_s8 }
 0x82d   : > { %v743_v56 = vpop.permute.xlu0 %742  ;;  %v745_v57 = vpop.permute.xlu1 %744 }
 0x82e   : > { %v752_v58 = vsel %vm604_vm10, %v743_v56, %v745_v57 }
 0x82f   : > { %v755_v59 = vadd.f32 %v752_v58, %v739_v49 }
 0x831   : > { %v747_v60 = vpop.permute.xlu0 %746  ;;  %760 = vrot.lane.b32.xlu1 %v755_v59, %s1081_s9  ;;  %v749_v61 = vpop.permute.xlu1 %748 }
 0x832   : > { %v750_v62 = vsel %vm604_vm10, %v747_v60, %v749_v61  ;;  %v753_v63 = vsel %vm604_vm10, %v749_v61, %v743_v56  ;;  %v751_v3 = vsel %vm604_vm10, %v745_v57, %v747_v60 }
 0x833   : > { %v754_v0 = vadd.f32 %v753_v63, %v738_v50  ;;  %v757_v1 = vadd.f32 %v750_v62, %v741_v55  ;;  %v756_v5 = vadd.f32 %v751_v3, %v740_v54  ;;  %v831_v50 = vrot.slane %v909_v17, %v1521_v7 }
 0x835   : > { %758 = vrot.lane.b32.xlu0 %v754_v0, %s1081_s9  ;;  %764 = vrot.lane.b32.xlu1 %v757_v1, %s1081_s9 }
 0x839   : > { %762 = vrot.lane.b32.xlu0 %v756_v5, %s1081_s9 }
 0x8a3   : > { %v761_v8 = vpop.permute.xlu1 %760 }
 0x8a7   : > { %v759_v10 = vpop.permute.xlu0 %758  ;;  %v765_v11 = vpop.permute.xlu1 %764 }
 0x8a8   : > { %v768_v14 = vsel %vm621_vm11, %v759_v10, %v761_v8  ;;  %v769_v15 = vsel %vm621_vm11, %v765_v11, %v759_v10 }
 0x8a9   : > { %v771_v16 = vadd.f32 %v768_v14, %v755_v59  ;;  %v770_v18 = vadd.f32 %v769_v15, %v754_v0 }
 0x8ab   : > { %v775_v23 = vmul.f32 0.0625, %v771_v16  ;;  %v774_v24 = vmul.f32 0.0625, %v770_v18  ;;  %v763_v25 = vpop.permute.xlu0 %762 }
 0x8ac   : > { %v766_v29 = vsel %vm621_vm11, %v763_v25, %v765_v11  ;;  %v767_v30 = vsel %vm621_vm11, %v761_v8, %v763_v25 }
 0x8ad   : > { %v779_v31 = vadd.f32 1e-05, %v775_v23  ;;  %v778_v32 = vadd.f32 1e-05, %v774_v24  ;;  %v772_v33 = vadd.f32 %v767_v30, %v756_v5  ;;  %v773_v34 = vadd.f32 %v766_v29, %v757_v1 }
 0x8af   : > { %1058 = vrsqrt.f32 %v779_v31  ;;  %v776_v13 = vmul.f32 0.0625, %v772_v33  ;;  %v777_v20 = vmul.f32 0.0625, %v773_v34 }
 0x8b0   : > { %1060 = vrsqrt.f32 %v778_v32 }
 0x8b1   : > { %v780_v2 = vadd.f32 1e-05, %v776_v13  ;;  %v781_v12 = vadd.f32 1e-05, %v777_v20 }
 0x8b3   : > { %1062 = vrsqrt.f32 %v780_v2 }
 0x8b4   : > { %1064 = vrsqrt.f32 %v781_v12 }
 0x8b9   : > { %v1059_v38 = vpop.eup %1058 }
 0x8ba   : > { %v1061_v39 = vpop.eup %1060  ;;  %v808_v40 = vmul.f32 %v1059_v38, %v794_v21 }
 0x8bb   : > { %v807_v43 = vmul.f32 %v1061_v39, %v790_v19 }
 0x8bc   : > { %v812_v44 = vmul.f32 %v808_v40, %v1680_v26 }
 0x8bd   : > { %v1063_v45 = vpop.eup %1062  ;;  %v811_v46 = vmul.f32 %v807_v43, %v1683_v27 }
 0x8be   : > { %v1065_v47 = vpop.eup %1064  ;;  %v837_v49 = vadd.f32 %v823_v22, %v812_v44  ;;  %v809_v9 = vmul.f32 %v1063_v45, %v798_v28 }
 0x8bf   : > { %v836_v4 = vadd.f32 %v819_v41, %v811_v46  ;;  %v810_v51 = vmul.f32 %v1065_v47, %v802_v42 }
 0x8c0   : > { %841 = vst [vmem:[%s170_s19 + $0x8] sm:$0xff] %v837_v49  ;;  %v813_v52 = vmul.f32 %v809_v9, %v1690_v35 }
 0x8c1   : > { %840 = vst [vmem:[%s170_s19] sm:$0xff] %v836_v4  ;;  %v814_v26 = vmul.f32 %v810_v51, %v1693_v36 }
 0x8c2   : > { %v838_v53 = vadd.f32 %v827_v48, %v813_v52 }
 0x8c3   : > { %v839_v54 = vadd.f32 %v831_v50, %v814_v26 }
 0x8c4   : > { %842 = vst [vmem:[%s170_s19 + $0x10] sm:$0xff] %v838_v53 }
 0x8c5   : > { %843 = vst [vmem:[%s170_s19 + $0x18] sm:$0xff] %v839_v54 }
 0x8c6 PF: > { %s13_s12 = sadd.s32 1, %s1072_s12  }
 0x8c7   : > { %p10_p4 = scmp.ge.s32.totalorder %s13_s12, 4  }
 0x8c9   :  { %12 = sbr.rel (!%p10_p4) target bundleno = 1 (0x1), region = 64 }

</bundles_post_ra>
